<compile_context>
chip_gen: v6e
topology: v6e:2x2x1
jax: 0.10.0
libtpu: 0.0.40
codegen_flags: <defaults>
</compile_context>

<pallas_src>
import functools

import jax
import jax.numpy as jnp
from jax.experimental import pallas as pl
from jax.experimental.pallas import tpu as pltpu

LANES = 128          # lane-dense last dim
BLOCK_ROWS = 2048    # (2048, 128) f32 block = 1 MiB per pipeline buffer


def _fuzz_kernel(params_ref, x_ref, o_ref, *, static_b):
    # params_ref lives in SMEM: [1/a, c, b]
    inv_a = params_ref[0]
    c = params_ref[1]

    x = x_ref[...].astype(jnp.float32)
    z = (x - c) * inv_a          # scalar reciprocal hoisted, VPU multiply
    base = z * z                 # ((x - c) / a) ** 2

    if static_b is not None:
        # Exponent known at trace time as a small non-negative integer:
        # repeated VPU multiplies, no transcendentals (and no log(0) path).
        if static_b == 0:
            powed = jnp.ones_like(base)
        else:
            powed = base
            for _ in range(static_b - 1):
                powed = powed * base
    else:
        # Generic runtime exponent: base ** b = exp(b * log(base)), base >= 0.
        b = params_ref[2]
        powed = jnp.exp(b * jnp.log(base))

    o_ref[...] = pl.reciprocal(1.0 + powed, approx=False).astype(o_ref.dtype)


def fuzzification_forward(x, a=1.0, b=2.0, c=3.0, *, block_rows=BLOCK_ROWS):
    """Elementwise fuzzification: 1 / (1 + (((x - c)/a)^2)^b)."""
    orig_shape = x.shape
    dtype = x.dtype
    n = x.size

    # Static integer-exponent specialization (module default b == 2).
    static_b = None
    if isinstance(b, (int, float)) and float(b).is_integer() and 0 <= int(b) <= 8:
        static_b = int(b)

    # Lane-dense (rows, 128) layout. Pad flat length only up to a multiple of
    # 128 (required for the reshape); ragged row tails are masked by the grid.
    xf = x.reshape(-1)
    rem = n % LANES
    if rem:
        xf = jnp.concatenate([xf, jnp.zeros((LANES - rem,), dtype=dtype)])
    rows = xf.shape[0] // LANES
    x2d = xf.reshape(rows, LANES)

    # Block rows: multiple of 8 when tiling, or the full (possibly ragged)
    # row extent when the whole slab fits in one block.
    tm = block_rows if rows > block_rows else rows
    grid = (pl.cdiv(rows, tm),)

    a32 = jnp.asarray(a, jnp.float32)
    params = jnp.stack([1.0 / a32,
                        jnp.asarray(c, jnp.float32),
                        jnp.asarray(b, jnp.float32)])

    out2d = pl.pallas_call(
        functools.partial(_fuzz_kernel, static_b=static_b),
        out_shape=jax.ShapeDtypeStruct((rows, LANES), dtype),
        grid=grid,
        in_specs=[
            pl.BlockSpec(memory_space=pltpu.MemorySpace.SMEM),   # scalar params
            pl.BlockSpec((tm, LANES), lambda i: (i, 0)),         # tiled input
        ],
        out_specs=pl.BlockSpec((tm, LANES), lambda i: (i, 0)),   # tiled output
        compiler_params=pltpu.CompilerParams(
            dimension_semantics=("parallel",)),
    )(params, x2d)

    out = out2d.reshape(-1)
    if rem:
        out = out[:n]
    return out.reshape(orig_shape)


def fuzzification_ref(x, a=1.0, b=2.0, c=3.0):
    """Pure-JAX reference matching the PyTorch forward."""
    xf = x.astype(jnp.float32)
    return (1.0 / (1.0 + jnp.power(jnp.power((xf - c) / a, 2.0), b))).astype(x.dtype)


if __name__ == "__main__":
    # Module defaults: a=1, b=2, c=3.
    a, b, c = 1.0, 2.0, 3.0
    key = jax.random.PRNGKey(0)

    # Small NCHW input consistent with the module.
    x = jax.random.normal(key, (2, 4, 16, 16), dtype=jnp.float32)
    out = jax.block_until_ready(fuzzification_forward(x, a, b, c))
    ref = fuzzification_ref(x, a, b, c)
    assert out.shape == x.shape and out.dtype == x.dtype
    assert jnp.allclose(out, ref, atol=1e-5, rtol=1e-5), "mismatch (static b)"

    # Ragged shape (flat size not a multiple of 128) exercises the tail path.
    x2 = jax.random.normal(jax.random.PRNGKey(1), (3, 5, 7, 9), dtype=jnp.float32)
    out2 = jax.block_until_ready(fuzzification_forward(x2, a, b, c))
    assert jnp.allclose(out2, fuzzification_ref(x2, a, b, c),
                        atol=1e-5, rtol=1e-5), "mismatch (ragged)"

    # Traced (runtime) exponent exercises the generic exp/log path.
    out3 = jax.block_until_ready(
        fuzzification_forward(x, a, jnp.float32(b), c))
    assert jnp.allclose(out3, ref, atol=1e-5, rtol=1e-5), "mismatch (traced b)"

    # Larger input exercises a multi-block grid (2 tiles of (2048, 128)).
    x4 = jax.random.normal(jax.random.PRNGKey(2), (8, 16, 64, 64),
                           dtype=jnp.float32)
    out4 = jax.block_until_ready(fuzzification_forward(x4, a, b, c))
    assert jnp.allclose(out4, fuzzification_ref(x4, a, b, c),
                        atol=1e-5, rtol=1e-5), "mismatch (multi-block)"

    print("KERNEL_OK")
</pallas_src>

<mosaic_0001>
module attributes {stable_mosaic.version = 11 : i64} {
  func.func @_fuzz_kernel(%arg0: i32, %arg1: memref<3xf32, #tpu.memory_space<smem>>, %arg2: memref<16x128xf32, #tpu.memory_space<vmem>>, %arg3: memref<16x128xf32, #tpu.memory_space<vmem>>) attributes {dimension_semantics = [#tpu.dimension_semantics<parallel>], iteration_bounds = array<i64: 1>, scalar_prefetch = 0 : i64, scratch_operands = 0 : i64, tpu.core_type = #tpu.core_type<tc>, window_params = [{transform_indices = @transform_0, window_bounds = array<i64: 3>}, {transform_indices = @transform_1, window_bounds = array<i64: 16, 128>}, {transform_indices = @transform_2, window_bounds = array<i64: 16, 128>}]} {
    %c0 = arith.constant 0 : index
    %0 = memref.load %arg1[%c0] : memref<3xf32, #tpu.memory_space<smem>>
    %c1 = arith.constant 1 : index
    %1 = memref.load %arg1[%c1] : memref<3xf32, #tpu.memory_space<smem>>
    %c0_0 = arith.constant 0 : index
    %c0_1 = arith.constant 0 : index
    %2 = vector.load %arg2[%c0_0, %c0_1] : memref<16x128xf32, #tpu.memory_space<vmem>>, vector<16x128xf32>
    %3 = vector.broadcast %1 : f32 to vector<16x128xf32>
    %4 = arith.subf %2, %3 : vector<16x128xf32>
    %5 = vector.broadcast %0 : f32 to vector<16x128xf32>
    %6 = arith.mulf %4, %5 : vector<16x128xf32>
    %7 = arith.mulf %6, %6 : vector<16x128xf32>
    %8 = arith.mulf %7, %7 : vector<16x128xf32>
    %cst = arith.constant 1.000000e+00 : f32
    %9 = vector.broadcast %cst : f32 to vector<16x128xf32>
    %10 = arith.addf %9, %8 : vector<16x128xf32>
    %11 = tpu.reciprocal %10 : vector<16x128xf32> -> vector<16x128xf32>
    %c0_2 = arith.constant 0 : index
    %c0_3 = arith.constant 0 : index
    %12 = vector.load %arg3[%c0_2, %c0_3] : memref<16x128xf32, #tpu.memory_space<vmem>>, vector<16x128xf32>
    tpu.vector_store %arg3[%c0_2, %c0_3], %11 {strides = array<i32>} : memref<16x128xf32, #tpu.memory_space<vmem>>, vector<16x128xf32>,
    return
  }
  func.func @transform_0(%arg0: i32) -> i32 {
    %c0_i32 = arith.constant 0 : i32
    %c0_i32_0 = arith.constant 0 : i32
    return %c0_i32 : i32
  }
  func.func @transform_1(%arg0: i32) -> (i32, i32) {
    %c0_i32 = arith.constant 0 : i32
    %c0_i32_0 = arith.constant 0 : i32
    return %arg0, %c0_i32 : i32, i32
  }
  func.func @transform_2(%arg0: i32) -> (i32, i32) {
    %c0_i32 = arith.constant 0 : i32
    %c0_i32_0 = arith.constant 0 : i32
    return %arg0, %c0_i32 : i32, i32
  }
}

</mosaic_0001>

<bundles_post_ra>
// kernel: tpu_custom_call.1
= control target key start
LH: loop header
LB: loop body
LE: loop exit
PB: predicated region body
PF: predicated region fallthrough
CT: control target
= control target key end

     0   :  { %7 = vsyncpa [#allocation5], 0  ;;  %s174_s0 = inlined_call_operand.hbm [shape: f32[3], index: 0, kind: input, shape index: {}]   ;;  %s175_s1 = inlined_call_operand.hbm [shape: f32[16,128], index: 1, kind: input, shape index: {}]   ;;  %s176_s2 = inlined_call_operand.hbm [shape: f32[16,128], index: 2, kind: output, shape index: {}]  }
   0x1   :  { %8 = vsyncpa [#allocation3], 0 }
   0x2   :  { %9 = vsyncpa [#allocation4], 0  ;;  %s139_s9 = smov [#allocation2]   ;;  %s140_s12 = smov [#allocation6]  }
   0x3   :  { %17 = dma.hbm_to_smem %s174_s0, 16, %s139_s9, [#allocation5]  }
   0x4   :  { %s23_s13 = sshll.u32 %s140_s12, 4  ;;  %s24_s13 = int_to_ptr.vmem [resolvable:$true] %s23_s13 }
   0x5   :  { %s101_s14 = scalar_lea.vmem %s24_s13, 256  ;;  %p106_p1 = scmp.lt.s32.totalorder %s24_s13, %s24_s13 }
   0x6   :  { %p102_p0 = scmp.ne.s32.totalorder %s24_s13, %s101_s14  ;;  %p107_p2 = scmp.lt.s32.totalorder %s101_s14, %s101_s14 }
   0x8   :  { %p108_p3 = por %p107_p2, %p106_p1 }
   0xa   :  { %p109_p4 = pnand %p108_p3, %p102_p0 }
   0xc   :  { %112 = shalt.err (!%p109_p4)
}
   0xd   :  { %s141_s15 = smov 128   ;;  %s142_s16 = smov 8  }
   0xe   :  { %29 = dma.hbm_to_vmem [thread:$0]  %s175_s1, 256, %s24_s13, [#allocation3], %s141_s15, %s141_s15, %s142_s16  }
   0xf   :  { %133 = dma.done.wait [#allocation5], 16  }
  0x10   :  { %134 = vsyncadd [#allocation5], 4294967280 }
  0x11   :  { %135 = dma.done.wait [#allocation3], 256  }
  0x12   :  { %136 = vsyncadd [#allocation3], 4294967040 }
  0x13   :  { %36 = sfence }
  0x14   :  { %s37_s0 = sld [smem:[#allocation2]]  ;;  %v39_v0 = vld [vmem:[#allocation6] sm:$0xff]  ;;  %v40_v1 = vld [vmem:[#allocation6 + $0x8] sm:$0xff]  ;;  %s143_s1 = smov [#allocation7]  }
  0x15   :  { %s75_s19 = sld [smem:[#allocation2 + $0x1]]  ;;  %s62_s20 = sshll.u32 %s143_s1, 4  ;;  %s63_s20 = int_to_ptr.vmem [resolvable:$true] %s62_s20 }
  0x16   :  { %s113_s21 = scalar_lea.vmem %s63_s20, 256  ;;  %p118_p6 = scmp.lt.s32.totalorder %s63_s20, %s63_s20 }
  0x17   :  { %p114_p5 = scmp.ne.s32.totalorder %s63_s20, %s113_s21  ;;  %p119_p7 = scmp.lt.s32.totalorder %s113_s21, %s113_s21 }
  0x19   :  { %p120_p8 = por %p119_p7, %p118_p6 }
  0x1a   :  { %v44_v3 = vstv %s37_s0 }
  0x1b   :  { %v41_v2 = vstv %s75_s19  ;;  %p121_p9 = pnand %p120_p8, %p114_p5 }
  0x1c   :  { %v42_v4 = vsub.f32 %v39_v0, %v41_v2  ;;  %v43_v5 = vsub.f32 %v40_v1, %v41_v2 }
  0x1e   :  { %v45_v6 = vmul.f32 %v44_v3, %v42_v4  ;;  %v46_v7 = vmul.f32 %v44_v3, %v43_v5 }
  0x20   :  { %v47_v8 = vmul.f32 %v45_v6, %v45_v6  ;;  %v48_v9 = vmul.f32 %v46_v7, %v46_v7 }
  0x22   :  { %v49_v10 = vmul.f32 %v47_v8, %v47_v8  ;;  %v50_v11 = vmul.f32 %v48_v9, %v48_v9 }
  0x24   :  { %v51_v12 = vadd.f32 1.0, %v49_v10  ;;  %v52_v13 = vadd.f32 1.0, %v50_v11 }
  0x26   :  { %81 = vrcp.f32 %v51_v12 }
  0x27   :  { %83 = vrcp.f32 %v52_v13 }
  0x33   :  { %v82_v14 = vpop.eup %81 }
  0x34   :  { %v84_v15 = vpop.eup %83  ;;  %55 = vst [vmem:[#allocation7] sm:$0xff] %v82_v14 }
  0x35   :  { %56 = vst [vmem:[#allocation7 + $0x8] sm:$0xff] %v84_v15 }
  0x36   :  { %124 = shalt.err (!%p121_p9)
}
  0x37   :  { %68 = dma.vmem_to_hbm [thread:$0]  %s63_s20, 256, %s176_s2, [#allocation4], %s141_s15, %s141_s15, %s142_s16  }
  0x38   :  { %137 = dma.done.wait [#allocation4], 256  }
  0x39   :  { %138 = vsyncadd [#allocation4], 4294967040 }
  0x3a   :  { %72 = vsyncpa [#allocation3], 1 }
  0x3b   :  { %73 = vsyncpa [#allocation4], 1 }
  0x3c   :  { %74 = vsyncpa [#allocation5], 1 }

</bundles_post_ra>
